<compile_context>
chip_gen: v5e
topology: v5e:2x2
jax: 0.10.0
libtpu: 0.0.40
codegen_flags: <defaults>
</compile_context>

<pallas_src>
import math

import jax
import jax.numpy as jnp
from jax.experimental import pallas as pl
from jax.experimental.pallas import tpu as pltpu

# ---- small, TPU-tile-friendly config implied by the module ----
B = 2            # batch
S = 8            # sequence length
D_MODEL = 128    # model width (lane-aligned)
VOCAB = 256      # vocab size (lane-dense output: multiple of 128)
DTYPE = jnp.float32


# ---------------- fused Pallas kernel ----------------

def _generator_kernel(x_ref, w_ref, b_ref, o_ref):
    # x: (tm, D) rows of activations, w: (D, V), b: (1, V)
    x = x_ref[...]
    logits = jnp.dot(x, w_ref[...], preferred_element_type=jnp.float32)
    logits = logits + b_ref[...].astype(jnp.float32)
    # numerically stable log_softmax along the last (lane) dim
    m = jnp.max(logits, axis=-1, keepdims=True)
    shifted = logits - m
    lse = jnp.log(jnp.sum(jnp.exp(shifted), axis=-1, keepdims=True))
    o_ref[...] = (shifted - lse).astype(o_ref.dtype)


def generator_forward(x, w, b, *, block_m=128):
    """x: (..., D) -> log_softmax(x @ w + b, axis=-1), w: (D, V), b: (V,)."""
    lead = x.shape[:-1]
    D = x.shape[-1]
    V = w.shape[1]
    x2 = x.reshape(-1, D)
    M = x2.shape[0]

    # one row-tile if the problem is tiny; otherwise pipeline over row blocks
    tm = M if M <= block_m else block_m
    assert M % tm == 0, "row count must be divisible by the row tile"
    assert tm % 8 == 0 and D % 128 == 0 and V % 128 == 0, "keep tiles (8,128)-aligned"

    out = pl.pallas_call(
        _generator_kernel,
        out_shape=jax.ShapeDtypeStruct((M, V), x.dtype),
        grid=(M // tm,),
        in_specs=[
            pl.BlockSpec((tm, D), lambda i: (i, 0)),   # activation row tile
            pl.BlockSpec((D, V), lambda i: (0, 0)),    # full weight, resident
            pl.BlockSpec((1, V), lambda i: (0, 0)),    # full bias, resident
        ],
        out_specs=pl.BlockSpec((tm, V), lambda i: (i, 0)),  # lane-dense output
        compiler_params=pltpu.CompilerParams(
            dimension_semantics=("parallel",)),
    )(x2, w, b.reshape(1, V))
    return out.reshape(*lead, V)


# ---------------- deterministic example run ----------------

if __name__ == "__main__":
    key = jax.random.PRNGKey(0)
    kx, kw, kb = jax.random.split(key, 3)

    # nn.Linear default init: U(-1/sqrt(fan_in), 1/sqrt(fan_in))
    lim = 1.0 / math.sqrt(D_MODEL)
    w = jax.random.uniform(kw, (D_MODEL, VOCAB), DTYPE, -lim, lim)
    b = jax.random.uniform(kb, (VOCAB,), DTYPE, -lim, lim)
    x = jax.random.normal(kx, (B, S, D_MODEL), DTYPE)

    fwd = jax.jit(generator_forward)
    out = jax.block_until_ready(fwd(x, w, b))

    # pure-JAX reference check
    ref = jax.nn.log_softmax(x @ w + b, axis=-1)

    assert out.shape == (B, S, VOCAB), out.shape
    assert bool(jnp.all(jnp.isfinite(out)))
    assert bool(jnp.allclose(out, ref, atol=1e-5, rtol=1e-5)), \
        float(jnp.max(jnp.abs(out - ref)))
    print("KERNEL_OK")
</pallas_src>

<mosaic_0001>
module attributes {stable_mosaic.version = 11 : i64} {
  func.func @_generator_kernel(%arg0: i32, %arg1: memref<16x128xf32, #tpu.memory_space<vmem>>, %arg2: memref<128x256xf32, #tpu.memory_space<vmem>>, %arg3: memref<1x256xf32, #tpu.memory_space<vmem>>, %arg4: memref<16x256xf32, #tpu.memory_space<vmem>>) attributes {dimension_semantics = [#tpu.dimension_semantics<parallel>], iteration_bounds = array<i64: 1>, scalar_prefetch = 0 : i64, scratch_operands = 0 : i64, tpu.core_type = #tpu.core_type<tc>, window_params = [{transform_indices = @transform_0, window_bounds = array<i64: 16, 128>}, {pipeline_mode = #tpu.pipeline_mode<synchronous>, transform_indices = @transform_1, window_bounds = array<i64: 128, 256>}, {pipeline_mode = #tpu.pipeline_mode<synchronous>, transform_indices = @transform_2, window_bounds = array<i64: 1, 256>}, {transform_indices = @transform_3, window_bounds = array<i64: 16, 256>}]} {
    %c0 = arith.constant 0 : index
    %c0_0 = arith.constant 0 : index
    %0 = vector.load %arg1[%c0, %c0_0] : memref<16x128xf32, #tpu.memory_space<vmem>>, vector<16x128xf32>
    %c0_1 = arith.constant 0 : index
    %c0_2 = arith.constant 0 : index
    %1 = vector.load %arg2[%c0_1, %c0_2] : memref<128x256xf32, #tpu.memory_space<vmem>>, vector<128x256xf32>
    %cst = arith.constant dense<0.000000e+00> : vector<16x256xf32>
    %2 = tpu.matmul %0, %1, %cst {dimension_numbers = #tpu.dot_dimension_numbers<[1], [0], [0], [1], [0, 0, 1, 1], [], []>} : vector<16x128xf32>, vector<128x256xf32>, vector<16x256xf32> -> vector<16x256xf32>
    %c0_3 = arith.constant 0 : index
    %c0_4 = arith.constant 0 : index
    %3 = vector.load %arg3[%c0_3, %c0_4] : memref<1x256xf32, #tpu.memory_space<vmem>>, vector<1x256xf32>
    %4 = vector.broadcast %3 : vector<1x256xf32> to vector<16x256xf32>
    %5 = arith.addf %2, %4 : vector<16x256xf32>
    %cst_5 = arith.constant dense<0xFF800000> : vector<16xf32>
    %6 = vector.multi_reduction <maximumf>, %5, %cst_5 [1] : vector<16x256xf32> to vector<16xf32>
    %7 = vector.shape_cast %6 : vector<16xf32> to vector<16x1xf32>
    %8 = vector.broadcast %7 : vector<16x1xf32> to vector<16x256xf32>
    %9 = arith.subf %5, %8 : vector<16x256xf32>
    %10 = math.exp %9 : vector<16x256xf32>
    %cst_6 = arith.constant dense<0.000000e+00> : vector<16xf32>
    %11 = vector.multi_reduction <add>, %10, %cst_6 [1] : vector<16x256xf32> to vector<16xf32>
    %12 = vector.shape_cast %11 : vector<16xf32> to vector<16x1xf32>
    %13 = math.log %12 : vector<16x1xf32>
    %14 = vector.broadcast %13 : vector<16x1xf32> to vector<16x256xf32>
    %15 = arith.subf %9, %14 : vector<16x256xf32>
    %c0_7 = arith.constant 0 : index
    %c0_8 = arith.constant 0 : index
    %16 = vector.load %arg4[%c0_7, %c0_8] : memref<16x256xf32, #tpu.memory_space<vmem>>, vector<16x256xf32>
    tpu.vector_store %arg4[%c0_7, %c0_8], %15 {strides = array<i32>} : memref<16x256xf32, #tpu.memory_space<vmem>>, vector<16x256xf32>,
    return
  }
  func.func @transform_0(%arg0: i32) -> (i32, i32) {
    %c0_i32 = arith.constant 0 : i32
    %c0_i32_0 = arith.constant 0 : i32
    return %arg0, %c0_i32 : i32, i32
  }
  func.func @transform_1(%arg0: i32) -> (i32, i32) {
    %c0_i32 = arith.constant 0 : i32
    %c0_i32_0 = arith.constant 0 : i32
    %c0_i32_1 = arith.constant 0 : i32
    return %c0_i32, %c0_i32_0 : i32, i32
  }
  func.func @transform_2(%arg0: i32) -> (i32, i32) {
    %c0_i32 = arith.constant 0 : i32
    %c0_i32_0 = arith.constant 0 : i32
    %c0_i32_1 = arith.constant 0 : i32
    return %c0_i32, %c0_i32_0 : i32, i32
  }
  func.func @transform_3(%arg0: i32) -> (i32, i32) {
    %c0_i32 = arith.constant 0 : i32
    %c0_i32_0 = arith.constant 0 : i32
    return %arg0, %c0_i32 : i32, i32
  }
}

</mosaic_0001>

<bundles_post_ra>
// kernel: generator_forward.1
= control target key start
LH: loop header
LB: loop body
LE: loop exit
PB: predicated region body
PF: predicated region fallthrough
CT: control target
= control target key end

     0   :  { %8 = vsyncpa [#allocation3], 0  ;;  %s363_s0 = inlined_call_operand.hbm [shape: f32[16,128], index: 0, kind: input, shape index: {}]   ;;  %s364_s1 = inlined_call_operand.hbm [shape: f32[128,256], index: 1, kind: input, shape index: {}]   ;;  %s365_s2 = inlined_call_operand.vmem [shape: f32[1,256], index: 2, kind: input, shape index: {}]   ;;  %s366_s3 = inlined_call_operand.hbm [shape: f32[16,256], index: 3, kind: output, shape index: {}]  }
   0x1   :  { %9 = vsyncpa [#allocation6], 0 }
   0x2   :  { %10 = vsyncpa [#allocation4], 0  ;;  %s15_s14 = sshll.u32 %s363_s0, 4  ;;  %s318_s15 = smov [#allocation2]   ;;  %s16_s14 = int_to_ptr.hbm [resolvable:$true] %s15_s14 }
   0x3   :  { %s17_s16 = sshll.u32 %s318_s15, 4  ;;  %s28_s19 = sshll.u32 %s364_s1, 4  ;;  %s18_s16 = int_to_ptr.vmem [resolvable:$true] %s17_s16  ;;  %s29_s19 = int_to_ptr.hbm [resolvable:$true] %s28_s19 }
   0x4   :  { %s319_s20 = smov 128   ;;  %s320_s21 = smov 8  }
   0x5   :  { %23 = dma.hbm_to_vmem [thread:$0]  %s16_s14, 256, %s18_s16, [#allocation3], %s319_s20, %s319_s20, %s320_s21  }
   0x6   :  { %s321_s22 = smov [#allocation5]   ;;  %s322_s24 = smov 256  }
   0x7   :  { %s30_s23 = sshll.u32 %s321_s22, 4  ;;  %s323_s25 = smov 16   ;;  %s31_s23 = int_to_ptr.vmem [resolvable:$true] %s30_s23 }
   0x8   :  { %36 = dma.hbm_to_vmem [thread:$0]  %s29_s19, 4096, %s31_s23, [#allocation6], %s322_s24, %s322_s24, %s323_s25  }
   0x9   :  { %312 = dma.done.wait [#allocation3], 256  }
   0xa   :  { %313 = vsyncadd [#allocation3], 4294967040 }
   0xb   :  { %314 = dma.done.wait [#allocation6], 4096  }
   0xc   :  { %315 = vsyncadd [#allocation6], 4294963200  ;;  %v79_v0 = vld [vmem:[#allocation5 + $0xf0] sm:$0xff]  ;;  %v80_v1 = vld [vmem:[#allocation5 + $0xf8] sm:$0xff]  ;;  %s175_s29 = sshll.u32 %s366_s3, 4  ;;  %s176_s29 = int_to_ptr.hbm [resolvable:$true] %s175_s29 }
   0xd   :  { %v77_v2 = vld [vmem:[#allocation5 + $0xe0] sm:$0xff]  ;;  %87 = vmatpush.msra.mxu0 %v79_v0  ;;  %110 = vmatpush.msra.mxu1 %v80_v1  ;;  %v78_v3 = vld [vmem:[#allocation5 + $0xe8] sm:$0xff]  ;;  %v75_v4 = vld [vmem:[#allocation5 + $0xd0] sm:$0xff] }
   0xe   :  { %189 = vmatpush.msra.mxu2 %v79_v0  ;;  %205 = vmatpush.msra.mxu3 %v80_v1  ;;  %v76_v5 = vld [vmem:[#allocation5 + $0xd8] sm:$0xff]  ;;  %v73_v6 = vld [vmem:[#allocation5 + $0xc0] sm:$0xff]  ;;  %v74_v7 = vld [vmem:[#allocation5 + $0xc8] sm:$0xff] }
   0xf   :  { %88 = vmatpush.msra.mxu0 %v77_v2  ;;  %111 = vmatpush.msra.mxu1 %v78_v3  ;;  %v71_v8 = vld [vmem:[#allocation5 + $0xb0] sm:$0xff]  ;;  %v72_v9 = vld [vmem:[#allocation5 + $0xb8] sm:$0xff]  ;;  %v69_v10 = vld [vmem:[#allocation5 + $0xa0] sm:$0xff] }
  0x10   :  { %190 = vmatpush.msra.mxu2 %v77_v2  ;;  %206 = vmatpush.msra.mxu3 %v78_v3  ;;  %v70_v11 = vld [vmem:[#allocation5 + $0xa8] sm:$0xff]  ;;  %v67_v12 = vld [vmem:[#allocation5 + $0x90] sm:$0xff]  ;;  %v68_v13 = vld [vmem:[#allocation5 + $0x98] sm:$0xff] }
  0x11   :  { %89 = vmatpush.msra.mxu0 %v75_v4  ;;  %112 = vmatpush.msra.mxu1 %v76_v5  ;;  %v65_v14 = vld [vmem:[#allocation5 + $0x80] sm:$0xff]  ;;  %v66_v15 = vld [vmem:[#allocation5 + $0x88] sm:$0xff]  ;;  %v63_v16 = vld [vmem:[#allocation5 + $0x70] sm:$0xff] }
  0x12   :  { %191 = vmatpush.msra.mxu2 %v75_v4  ;;  %207 = vmatpush.msra.mxu3 %v76_v5  ;;  %v64_v17 = vld [vmem:[#allocation5 + $0x78] sm:$0xff]  ;;  %v61_v18 = vld [vmem:[#allocation5 + $0x60] sm:$0xff]  ;;  %v62_v19 = vld [vmem:[#allocation5 + $0x68] sm:$0xff] }
  0x13   :  { %90 = vmatpush.msra.mxu0 %v73_v6  ;;  %113 = vmatpush.msra.mxu1 %v74_v7  ;;  %v59_v20 = vld [vmem:[#allocation5 + $0x50] sm:$0xff]  ;;  %v60_v21 = vld [vmem:[#allocation5 + $0x58] sm:$0xff]  ;;  %v57_v22 = vld [vmem:[#allocation5 + $0x40] sm:$0xff] }
  0x14   :  { %192 = vmatpush.msra.mxu2 %v73_v6  ;;  %208 = vmatpush.msra.mxu3 %v74_v7  ;;  %v58_v23 = vld [vmem:[#allocation5 + $0x48] sm:$0xff]  ;;  %v55_v24 = vld [vmem:[#allocation5 + $0x30] sm:$0xff]  ;;  %v56_v25 = vld [vmem:[#allocation5 + $0x38] sm:$0xff] }
  0x15   :  { %91 = vmatpush.msra.mxu0 %v71_v8  ;;  %114 = vmatpush.msra.mxu1 %v72_v9  ;;  %v53_v26 = vld [vmem:[#allocation5 + $0x20] sm:$0xff]  ;;  %v54_v27 = vld [vmem:[#allocation5 + $0x28] sm:$0xff]  ;;  %v51_v28 = vld [vmem:[#allocation5 + $0x10] sm:$0xff] }
  0x16   :  { %193 = vmatpush.msra.mxu2 %v71_v8  ;;  %209 = vmatpush.msra.mxu3 %v72_v9  ;;  %v52_v29 = vld [vmem:[#allocation5 + $0x18] sm:$0xff]  ;;  %v49_v30 = vld [vmem:[#allocation5] sm:$0xff]  ;;  %v50_v31 = vld [vmem:[#allocation5 + $0x8] sm:$0xff] }
  0x17   :  { %92 = vmatpush.msra.mxu0 %v69_v10  ;;  %115 = vmatpush.msra.mxu1 %v70_v11  ;;  %v47_v32 = vld [vmem:[#allocation2] sm:$0xff]  ;;  %v48_v33 = vld [vmem:[#allocation2 + $0x8] sm:$0xff] }
  0x18   :  { %194 = vmatpush.msra.mxu2 %v69_v10  ;;  %210 = vmatpush.msra.mxu3 %v70_v11  ;;  %v81_v34 = vld [vmem:[%s365_s2] sm:$0x3]  ;;  %s324_s2 = smov [#allocation7]  }
  0x19   :  { %93 = vmatpush.msra.mxu0 %v67_v12  ;;  %116 = vmatpush.msra.mxu1 %v68_v13  ;;  %v83_v35 = vperm.slane %v81_v34, 0  ;;  %v84_v36 = vperm.slane %v81_v34, 1  ;;  %s173_s26 = sshll.u32 %s324_s2, 4  ;;  %s174_s26 = int_to_ptr.vmem [resolvable:$true] %s173_s26 }
  0x1a   :  { %195 = vmatpush.msra.mxu2 %v67_v12  ;;  %211 = vmatpush.msra.mxu3 %v68_v13 }
  0x1b   :  { %94 = vmatpush.msra.mxu0 %v65_v14  ;;  %117 = vmatpush.msra.mxu1 %v66_v15 }
  0x1c   :  { %196 = vmatpush.msra.mxu2 %v65_v14  ;;  %212 = vmatpush.msra.mxu3 %v66_v15 }
  0x1d   :  { %95 = vmatpush.msra.mxu0 %v63_v16  ;;  %118 = vmatpush.msra.mxu1 %v64_v17 }
  0x1e   :  { %197 = vmatpush.msra.mxu2 %v63_v16  ;;  %213 = vmatpush.msra.mxu3 %v64_v17 }
  0x1f   :  { %96 = vmatpush.msra.mxu0 %v61_v18  ;;  %119 = vmatpush.msra.mxu1 %v62_v19 }
  0x20   :  { %198 = vmatpush.msra.mxu2 %v61_v18  ;;  %214 = vmatpush.msra.mxu3 %v62_v19 }
  0x21   :  { %97 = vmatpush.msra.mxu0 %v59_v20  ;;  %120 = vmatpush.msra.mxu1 %v60_v21 }
  0x22   :  { %199 = vmatpush.msra.mxu2 %v59_v20  ;;  %215 = vmatpush.msra.mxu3 %v60_v21 }
  0x23   :  { %98 = vmatpush.msra.mxu0 %v57_v22  ;;  %121 = vmatpush.msra.mxu1 %v58_v23 }
  0x24   :  { %200 = vmatpush.msra.mxu2 %v57_v22  ;;  %216 = vmatpush.msra.mxu3 %v58_v23 }
  0x25   :  { %99 = vmatpush.msra.mxu0 %v55_v24  ;;  %122 = vmatpush.msra.mxu1 %v56_v25 }
  0x26   :  { %201 = vmatpush.msra.mxu2 %v55_v24  ;;  %217 = vmatpush.msra.mxu3 %v56_v25 }
  0x27   :  { %100 = vmatpush.msra.mxu0 %v53_v26  ;;  %123 = vmatpush.msra.mxu1 %v54_v27 }
  0x28   :  { %202 = vmatpush.msra.mxu2 %v53_v26  ;;  %218 = vmatpush.msra.mxu3 %v54_v27 }
  0x29   :  { %101 = vmatpush.msra.mxu0 %v51_v28  ;;  %124 = vmatpush.msra.mxu1 %v52_v29 }
  0x2a   :  { %203 = vmatpush.msra.mxu2 %v51_v28  ;;  %219 = vmatpush.msra.mxu3 %v52_v29 }
  0x2b   :  { %102 = vmatpush.msra.mxu0 %v49_v30  ;;  %125 = vmatpush.msra.mxu1 %v50_v31 }
  0x2c   :  { %103 = vmatmul.f32.vlgmr.msra.gmra.mxu0 %v47_v32  ;;  %126 = vmatmul.f32.vlgmr.msra.gmra.mxu1 %v47_v32 }
  0x2d   :  { %204 = vmatpush.msra.mxu2 %v49_v30  ;;  %220 = vmatpush.msra.mxu3 %v50_v31 }
  0x2e   :  { %106 = vmatmul.f32.vlgmr.msra.gmra.mxu2 %v48_v33  ;;  %129 = vmatmul.f32.vlgmr.msra.gmra.mxu3 %v48_v33 }
  0xa9   :  { %v104_v37 = vpop.f32.mrf.mxu0  ;;  %v127_v38 = vpop.f32.mrf.mxu1 }
  0xaa   :  { %v105_v39 = vadd.f32 %v104_v37, %v83_v35  ;;  %v128_v40 = vadd.f32 %v127_v38, %v84_v36 }
  0xac   :  { %v133_v41 = vmax.f32 %v105_v39, %v128_v40 }
  0xae   :  { %134 = vmax.xlane.f32.xlu0 %v133_v41 }
  0xb1   :  { %v107_v42 = vpop.f32.mrf.mxu2  ;;  %v130_v43 = vpop.f32.mrf.mxu3 }
  0xb2   :  { %v108_v44 = vadd.f32 %v107_v42, %v83_v35  ;;  %v131_v45 = vadd.f32 %v130_v43, %v84_v36 }
  0xb4   :  { %v136_v46 = vmax.f32 %v108_v44, %v131_v45 }
  0xb6   :  { %137 = vmax.xlane.f32.xlu0 %v136_v46 }
 0x121   :  { %v135_v47 = vpop.xlane.xlu0 %134 }
 0x122   :  { %v139_v48 = vsub.f32 %v105_v39, %v135_v47  ;;  %v140_v49 = vsub.f32 %v128_v40, %v135_v47 }
 0x124   :  { %v143_v50 = vmul.f32 1.442695, %v139_v48  ;;  %v145_v51 = vmul.f32 1.442695, %v140_v49 }
 0x126   :  { %228 = vpow2.f32 %v143_v50 }
 0x127   :  { %230 = vpow2.f32 %v145_v51 }
 0x129   :  { %v138_v52 = vpop.xlane.xlu0 %137 }
 0x12a   :  { %v141_v53 = vsub.f32 %v108_v44, %v138_v52  ;;  %v142_v54 = vsub.f32 %v131_v45, %v138_v52 }
 0x12c   :  { %v229_v55 = vpop.eup %228  ;;  %v147_v56 = vmul.f32 1.442695, %v141_v53  ;;  %v149_v57 = vmul.f32 1.442695, %v142_v54 }
 0x12d   :  { %v231_v58 = vpop.eup %230 }
 0x12e   :  { %232 = vpow2.f32 %v147_v56  ;;  %v151_v59 = vadd.f32 %v231_v58, %v229_v55 }
 0x12f   :  { %234 = vpow2.f32 %v149_v57 }
 0x130   :  { %152 = vadd.xlane.f32.xlu1 %v151_v59 }
 0x134   :  { %v233_v60 = vpop.eup %232 }
 0x135   :  { %v235_v61 = vpop.eup %234 }
 0x136   :  { %v154_v62 = vadd.f32 %v235_v61, %v233_v60 }
 0x138   :  { %155 = vadd.xlane.f32.xlu1 %v154_v62 }
 0x1a3   :  { %v153_v63 = vpop.xlane.xlu1 %152 }
 0x1a4   :  { %236 = vlog2.f32 %v153_v63 }
 0x1aa   :  { %v237_v0 = vpop.eup %236 }
 0x1ab   :  { %v158_v1 = vmul.f32 0.6931472, %v237_v0  ;;  %v156_v2 = vpop.xlane.xlu1 %155 }
 0x1ac   :  { %238 = vlog2.f32 %v156_v2 }
 0x1ad   :  { %v161_v3 = vsub.f32 %v139_v48, %v158_v1  ;;  %v162_v4 = vsub.f32 %v140_v49, %v158_v1 }
 0x1af   :  { %165 = vst [vmem:[#allocation7] sm:$0xff] %v161_v3 }
 0x1b0   :  { %166 = vst [vmem:[#allocation7 + $0x8] sm:$0xff] %v162_v4 }
 0x1b2   :  { %v239_v5 = vpop.eup %238 }
 0x1b3   :  { %v160_v6 = vmul.f32 0.6931472, %v239_v5 }
 0x1b5   :  { %v163_v7 = vsub.f32 %v141_v53, %v160_v6  ;;  %v164_v8 = vsub.f32 %v142_v54, %v160_v6 }
 0x1b7   :  { %167 = vst [vmem:[#allocation7 + $0x10] sm:$0xff] %v163_v7 }
 0x1b8   :  { %168 = vst [vmem:[#allocation7 + $0x18] sm:$0xff] %v164_v8 }
 0x1b9   :  { %181 = dma.vmem_to_hbm [thread:$0]  %s174_s26, 512, %s176_s29, [#allocation4], %s322_s24, %s322_s24, %s323_s25  }
 0x1ba   :  { %316 = dma.done.wait [#allocation4], 512  }
 0x1bb   :  { %317 = vsyncadd [#allocation4], 4294966784 }
 0x1bc   :  { %186 = vsyncpa [#allocation3], 1 }
 0x1bd   :  { %187 = vsyncpa [#allocation6], 1 }
 0x1be   :  { %188 = vsyncpa [#allocation4], 1 }

</bundles_post_ra>
